<compile_context>
chip_gen: v7x
topology: tpu7x:2x2x1
jax: 0.10.0
libtpu: 0.0.40
codegen_flags: <defaults>
</compile_context>

<pallas_src>
import functools

import jax
import jax.numpy as jnp
from jax.experimental import pallas as pl
from jax.experimental.pallas import tpu as pltpu


def _round_up(x, m):
    return (x + m - 1) // m * m


def _round_down(x, m):
    return x // m * m


def _default_transcendental_dtype():
    """bf16 sqrt/exp on v6e/v7x (EUP ~2x); f32 on v5e and older (no bf16 EUP)."""
    try:
        kind = jax.devices()[0].device_kind.lower()
    except Exception:
        return jnp.float32
    if ("v6" in kind) or ("v7" in kind) or ("tpu7" in kind):
        return jnp.bfloat16
    return jnp.float32


def _diag_envelope_kernel(ae2_ref, sigma2_ref, pi_ref, out_ref, *,
                          n_atoms, n_dim, chunk_n, trans_dtype):
    """One grid step = one lane-dense [D, tile_n] column block of electrons.

    ae2_ref   : [n_atoms*n_dim, tile_n]  squared ae, transposed (N on lanes)
    sigma2_ref: [n_atoms*n_dim, D, 1]    squared sigma, column layout (resident)
    pi_ref    : [n_atoms, D, 1]          pi in trans_dtype, column layout (resident)
    out_ref   : [D, tile_n]              transposed output (N on lanes)
    """
    d, tile_n = out_ref.shape
    n_sub = tile_n // chunk_n

    # Inner loop over lane sub-chunks: the big BlockSpec tile amortizes the
    # ~600-cycle per-grid-step pipeline overhead, while the per-sub-chunk
    # working set (acc + q + env) stays inside the 64-vreg file.  pl.loop
    # (scf.for) bounds the vreg live ranges per iteration.
    @pl.loop(0, n_sub)
    def _(c):
        start = pl.multiple_of(c * chunk_n, 128)
        acc = jnp.zeros((d, chunk_n), dtype=jnp.float32)
        # n_atoms is small & static -> full Python unroll; pure VPU/EUP work.
        for a in range(n_atoms):
            j0 = a * n_dim
            # q[d, n] = sum_k sigma^2[a,k,d] * ae^2[n,a,k]
            # (K=3 contraction as broadcast FMAs on the VPU; MXU would be
            #  badly under-utilized at K=3.)
            # TODO(synk): if the bundle dump shows explicit VPU sublane
            # broadcasts here, switch to stride-0 loads ae2_ref[pl.ds(j, d,
            # stride=0), ...] to move them onto the under-used vld slot.
            q = sigma2_ref[j0] * ae2_ref[
                pl.ds(j0, 1), pl.ds(start, chunk_n)].astype(jnp.float32)
            for k in range(1, n_dim):
                j = j0 + k
                q = q + sigma2_ref[j] * ae2_ref[
                    pl.ds(j, 1), pl.ds(start, chunk_n)].astype(jnp.float32)
            # sqrt/exp go to the EUP; trans_dtype=bfloat16 roughly doubles EUP
            # throughput on v6e/v7x.  sqrt(0)=0, exp(0)=1 keeps zero-padded
            # lanes NaN-free (they are sliced away in the wrapper).
            r = jnp.sqrt(q.astype(trans_dtype))
            env = jnp.exp(-r)
            # pi lives in trans_dtype so this multiply is half-width on the
            # bf16 path; one convert per atom, accumulation stays f32.
            acc = acc + (pi_ref[a] * env).astype(jnp.float32)
        out_ref[:, pl.ds(start, chunk_n)] = acc.astype(out_ref.dtype)


def diagonal_envelope(ae, sigma, pi, *, tile_n=4096, chunk_n=None,
                      transcendental_dtype=None, lane_major_output=False):
    """ae: [B, E, A, ndim], sigma: [A, ndim, D], pi: [A, D] -> [B, E, D].

    If lane_major_output=True, returns the kernel-native [D, B*E] layout so a
    downstream consumer can skip the extra HBM transpose (matters most on v5e).
    """
    b, e, a, ndim = ae.shape
    assert sigma.shape[:2] == (a, ndim) and pi.shape[0] == a
    d = pi.shape[1]
    n = b * e

    if transcendental_dtype is None:
        transcendental_dtype = _default_transcendental_dtype()

    # Lane sub-chunk size: bound the in-kernel working set (~3*D*chunk*4B) to
    # ~48 of the 64 vregs so the kernel never flips from EUP/VPU-bound to
    # spill-bound when output_dim grows.
    if chunk_n is None:
        chunk_n = max(128, min(512, _round_down(max(16384 // d, 128), 128)))
        chunk_n = min(chunk_n, _round_up(n, 128))  # don't over-pad tiny inputs
        # TODO(synk): for very large D (>=256) a VMEM scratch accumulator is
        # needed to fully avoid spills; chunk_n=128 is best-effort there.
    chunk_n = max(128, _round_up(chunk_n, 128))

    # Electrons on the lane axis: square ae once (exact, since (ae*sigma)^2 =
    # ae^2*sigma^2) and transpose so N is the minor dim.
    # NOTE: squaring before summing can over/underflow f32 for |ae*sigma|
    # outside roughly [1e-19, 1e19], unlike the norm-based reference;
    # irrelevant for physical coordinates.
    ae2_t = jnp.transpose((ae * ae).reshape(n, a * ndim))           # [A*ndim, N]

    # Big tiles amortize per-grid-step overhead; cap so the grid has >=2 steps
    # whenever possible so both v7x TensorCores get work (costs ~nothing on
    # single-TC v5e/v6e).
    n_chunk_pad = _round_up(max(n, chunk_n), chunk_n)
    tile = min(_round_up(tile_n, chunk_n), n_chunk_pad)
    if n_chunk_pad >= 2 * chunk_n:
        tile = min(tile, _round_up(-(-n_chunk_pad // 2), chunk_n))
    tile = max(tile, chunk_n)
    n_pad = _round_up(n, tile)
    if n_pad != n:
        ae2_t = jnp.pad(ae2_t, ((0, 0), (0, n_pad - n)))

    # Resident constants: squared / cast once here instead of every grid step,
    # stored as [.., D, 1] columns so they broadcast against lane-dense tiles.
    sigma2 = (sigma.astype(jnp.float32) ** 2).reshape(a * ndim, d)[:, :, None]
    pi_c = pi.astype(transcendental_dtype)[:, :, None]              # [A, D, 1]

    kernel = functools.partial(_diag_envelope_kernel, n_atoms=a, n_dim=ndim,
                               chunk_n=chunk_n, trans_dtype=transcendental_dtype)
    out_t = pl.pallas_call(
        kernel,
        out_shape=jax.ShapeDtypeStruct((d, n_pad), ae.dtype),
        grid_spec=pltpu.PrefetchScalarGridSpec(
            num_scalar_prefetch=0,
            grid=(n_pad // tile,),
            in_specs=[
                pl.BlockSpec((a * ndim, tile), lambda i: (0, i)),     # ae^2 tile
                pl.BlockSpec((a * ndim, d, 1), lambda i: (0, 0, 0)),  # sigma^2 (resident)
                pl.BlockSpec((a, d, 1), lambda i: (0, 0, 0)),         # pi (resident)
            ],
            out_specs=pl.BlockSpec((d, tile), lambda i: (0, i)),      # [D, N] transposed
        ),
        compiler_params=pltpu.CompilerParams(
            dimension_semantics=("parallel",)),                       # megacore sharding
    )(ae2_t, sigma2, pi_c)

    if lane_major_output:
        return out_t[:, :n]                                          # [D, B*E]
    return jnp.transpose(out_t[:, :n]).reshape(b, e, d)


def diagonal_envelope_ref(ae, sigma, pi):
    """Pure-JAX reference mirroring the PyTorch forward exactly."""
    ae_sigma = ae[..., None] * sigma[None, None, ...]       # [B,E,A,3,D]
    r_ae_sigma = jnp.linalg.norm(ae_sigma, axis=3)          # [B,E,A,D]
    return jnp.sum(jnp.exp(-r_ae_sigma) * pi[None, None, ...], axis=2)


if __name__ == "__main__":
    # Small shapes consistent with the module's forward signature.
    batch, n_electrons, n_atoms, n_dim = 2, 8, 4, 3
    output_dim = 32

    key = jax.random.PRNGKey(0)
    k_ae, k_pi, k_sigma = jax.random.split(key, 3)
    ae = jax.random.normal(k_ae, (batch, n_electrons, n_atoms, n_dim),
                           dtype=jnp.float32)
    # torch init is ones; use deterministic non-trivial params so the check
    # actually exercises the sigma/pi handling and layouts.
    pi = 1.0 + 0.1 * jax.random.normal(k_pi, (n_atoms, output_dim), jnp.float32)
    sigma = 1.0 + 0.1 * jax.random.normal(
        k_sigma, (n_atoms, n_dim, output_dim), jnp.float32)

    ref = diagonal_envelope_ref(ae, sigma, pi)

    # f32 transcendentals: exact path (the right choice on v5e).
    out_f32 = jax.block_until_ready(
        diagonal_envelope(ae, sigma, pi, transcendental_dtype=jnp.float32))
    assert out_f32.shape == (batch, n_electrons, output_dim)
    assert jnp.allclose(out_f32, ref, atol=1e-5, rtol=1e-5), "mismatch (f32)"

    # Kernel-native [D, N] layout (skips the wrapper transpose for consumers
    # that can take it directly).
    out_lm = jax.block_until_ready(
        diagonal_envelope(ae, sigma, pi, transcendental_dtype=jnp.float32,
                          lane_major_output=True))
    assert jnp.allclose(jnp.transpose(out_lm).reshape(batch, n_electrons, output_dim),
                        ref, atol=1e-5, rtol=1e-5), "mismatch (lane-major)"

    # bf16 sqrt/exp path (EUP win on v6e/v7x); numerically fine for the forward.
    out_bf16 = jax.block_until_ready(
        diagonal_envelope(ae, sigma, pi, transcendental_dtype=jnp.bfloat16))
    assert jnp.allclose(out_bf16, ref, atol=3e-2, rtol=3e-2), "mismatch (bf16)"

    # Chip-default dtype on a shape that exercises padding, multiple grid
    # steps, and the in-kernel lane sub-chunk loop (N=600, tile=256, chunk=128).
    batch2, n_e2 = 2, 300
    ae_big = jax.random.normal(jax.random.PRNGKey(1),
                               (batch2, n_e2, n_atoms, n_dim), jnp.float32)
    ref_big = diagonal_envelope_ref(ae_big, sigma, pi)
    out_big = jax.block_until_ready(
        diagonal_envelope(ae_big, sigma, pi, tile_n=256, chunk_n=128))
    assert out_big.shape == (batch2, n_e2, output_dim)
    assert jnp.allclose(out_big, ref_big, atol=3e-2, rtol=3e-2), "mismatch (tiled)"

    print("KERNEL_OK")
</pallas_src>

<mosaic_0001>
module attributes {stable_mosaic.version = 11 : i64} {
  func.func @_diag_envelope_kernel(%arg0: i32, %arg1: memref<12x128xf32, #tpu.memory_space<vmem>>, %arg2: memref<12x32x1xf32, #tpu.memory_space<vmem>>, %arg3: memref<4x32x1xf32, #tpu.memory_space<vmem>>, %arg4: memref<32x128xf32, #tpu.memory_space<vmem>>) attributes {dimension_semantics = [#tpu.dimension_semantics<parallel>], iteration_bounds = array<i64: 1>, scalar_prefetch = 0 : i64, scratch_operands = 0 : i64, tpu.core_type = #tpu.core_type<tc>, window_params = [{transform_indices = @transform_0, window_bounds = array<i64: 12, 128>}, {pipeline_mode = #tpu.pipeline_mode<synchronous>, transform_indices = @transform_1, window_bounds = array<i64: 12, 32, 1>}, {pipeline_mode = #tpu.pipeline_mode<synchronous>, transform_indices = @transform_2, window_bounds = array<i64: 4, 32, 1>}, {transform_indices = @transform_3, window_bounds = array<i64: 32, 128>}]} {
    %c0_i32 = arith.constant 0 : i32
    %c1_i32 = arith.constant 1 : i32
    %0 = arith.muli %c0_i32, %c1_i32 : i32
    %c0_i32_0 = arith.constant 0 : i32
    %1 = arith.addi %c0_i32_0, %0 : i32
    %c128_i32 = arith.constant 128 : i32
    %2 = arith.muli %1, %c128_i32 : i32
    %3 = tpu.assume_multiple %2, 128 : i32
    %cst = arith.constant 0.000000e+00 : f32
    %4 = vector.broadcast %cst : f32 to vector<32x128xf32>
    %c0 = arith.constant 0 : index
    %c0_1 = arith.constant 0 : index
    %c0_2 = arith.constant 0 : index
    %5 = vector.load %arg2[%c0, %c0_1, %c0_2] : memref<12x32x1xf32, #tpu.memory_space<vmem>>, vector<1x32x1xf32>
    %6 = vector.shape_cast %5 : vector<1x32x1xf32> to vector<32x1xf32>
    %c0_3 = arith.constant 0 : index
    %7 = arith.index_cast %3 : i32 to index
    %8 = vector.load %arg1[%c0_3, %7] : memref<12x128xf32, #tpu.memory_space<vmem>>, vector<1x128xf32>
    %9 = vector.broadcast %6 : vector<32x1xf32> to vector<32x128xf32>
    %10 = vector.broadcast %8 : vector<1x128xf32> to vector<32x128xf32>
    %11 = arith.mulf %9, %10 : vector<32x128xf32>
    %c1 = arith.constant 1 : index
    %c0_4 = arith.constant 0 : index
    %c0_5 = arith.constant 0 : index
    %12 = vector.load %arg2[%c1, %c0_4, %c0_5] : memref<12x32x1xf32, #tpu.memory_space<vmem>>, vector<1x32x1xf32>
    %13 = vector.shape_cast %12 : vector<1x32x1xf32> to vector<32x1xf32>
    %c1_6 = arith.constant 1 : index
    %14 = arith.index_cast %3 : i32 to index
    %15 = vector.load %arg1[%c1_6, %14] : memref<12x128xf32, #tpu.memory_space<vmem>>, vector<1x128xf32>
    %16 = vector.broadcast %13 : vector<32x1xf32> to vector<32x128xf32>
    %17 = vector.broadcast %15 : vector<1x128xf32> to vector<32x128xf32>
    %18 = arith.mulf %16, %17 : vector<32x128xf32>
    %19 = arith.addf %11, %18 : vector<32x128xf32>
    %c2 = arith.constant 2 : index
    %c0_7 = arith.constant 0 : index
    %c0_8 = arith.constant 0 : index
    %20 = vector.load %arg2[%c2, %c0_7, %c0_8] : memref<12x32x1xf32, #tpu.memory_space<vmem>>, vector<1x32x1xf32>
    %21 = vector.shape_cast %20 : vector<1x32x1xf32> to vector<32x1xf32>
    %c2_9 = arith.constant 2 : index
    %22 = arith.index_cast %3 : i32 to index
    %23 = vector.load %arg1[%c2_9, %22] : memref<12x128xf32, #tpu.memory_space<vmem>>, vector<1x128xf32>
    %24 = vector.broadcast %21 : vector<32x1xf32> to vector<32x128xf32>
    %25 = vector.broadcast %23 : vector<1x128xf32> to vector<32x128xf32>
    %26 = arith.mulf %24, %25 : vector<32x128xf32>
    %27 = arith.addf %19, %26 : vector<32x128xf32>
    %28 = math.sqrt %27 : vector<32x128xf32>
    %cst_10 = arith.constant 0.000000e+00 : f32
    %29 = vector.broadcast %cst_10 : f32 to vector<32x128xf32>
    %30 = arith.subf %29, %28 : vector<32x128xf32>
    %31 = math.exp %30 : vector<32x128xf32>
    %c0_11 = arith.constant 0 : index
    %c0_12 = arith.constant 0 : index
    %c0_13 = arith.constant 0 : index
    %32 = vector.load %arg3[%c0_11, %c0_12, %c0_13] : memref<4x32x1xf32, #tpu.memory_space<vmem>>, vector<1x32x1xf32>
    %33 = vector.shape_cast %32 : vector<1x32x1xf32> to vector<32x1xf32>
    %34 = vector.broadcast %33 : vector<32x1xf32> to vector<32x128xf32>
    %35 = arith.mulf %34, %31 : vector<32x128xf32>
    %36 = arith.addf %4, %35 : vector<32x128xf32>
    %c3 = arith.constant 3 : index
    %c0_14 = arith.constant 0 : index
    %c0_15 = arith.constant 0 : index
    %37 = vector.load %arg2[%c3, %c0_14, %c0_15] : memref<12x32x1xf32, #tpu.memory_space<vmem>>, vector<1x32x1xf32>
    %38 = vector.shape_cast %37 : vector<1x32x1xf32> to vector<32x1xf32>
    %c3_16 = arith.constant 3 : index
    %39 = arith.index_cast %3 : i32 to index
    %40 = vector.load %arg1[%c3_16, %39] : memref<12x128xf32, #tpu.memory_space<vmem>>, vector<1x128xf32>
    %41 = vector.broadcast %38 : vector<32x1xf32> to vector<32x128xf32>
    %42 = vector.broadcast %40 : vector<1x128xf32> to vector<32x128xf32>
    %43 = arith.mulf %41, %42 : vector<32x128xf32>
    %c4 = arith.constant 4 : index
    %c0_17 = arith.constant 0 : index
    %c0_18 = arith.constant 0 : index
    %44 = vector.load %arg2[%c4, %c0_17, %c0_18] : memref<12x32x1xf32, #tpu.memory_space<vmem>>, vector<1x32x1xf32>
    %45 = vector.shape_cast %44 : vector<1x32x1xf32> to vector<32x1xf32>
    %c4_19 = arith.constant 4 : index
    %46 = arith.index_cast %3 : i32 to index
    %47 = vector.load %arg1[%c4_19, %46] : memref<12x128xf32, #tpu.memory_space<vmem>>, vector<1x128xf32>
    %48 = vector.broadcast %45 : vector<32x1xf32> to vector<32x128xf32>
    %49 = vector.broadcast %47 : vector<1x128xf32> to vector<32x128xf32>
    %50 = arith.mulf %48, %49 : vector<32x128xf32>
    %51 = arith.addf %43, %50 : vector<32x128xf32>
    %c5 = arith.constant 5 : index
    %c0_20 = arith.constant 0 : index
    %c0_21 = arith.constant 0 : index
    %52 = vector.load %arg2[%c5, %c0_20, %c0_21] : memref<12x32x1xf32, #tpu.memory_space<vmem>>, vector<1x32x1xf32>
    %53 = vector.shape_cast %52 : vector<1x32x1xf32> to vector<32x1xf32>
    %c5_22 = arith.constant 5 : index
    %54 = arith.index_cast %3 : i32 to index
    %55 = vector.load %arg1[%c5_22, %54] : memref<12x128xf32, #tpu.memory_space<vmem>>, vector<1x128xf32>
    %56 = vector.broadcast %53 : vector<32x1xf32> to vector<32x128xf32>
    %57 = vector.broadcast %55 : vector<1x128xf32> to vector<32x128xf32>
    %58 = arith.mulf %56, %57 : vector<32x128xf32>
    %59 = arith.addf %51, %58 : vector<32x128xf32>
    %60 = math.sqrt %59 : vector<32x128xf32>
    %cst_23 = arith.constant 0.000000e+00 : f32
    %61 = vector.broadcast %cst_23 : f32 to vector<32x128xf32>
    %62 = arith.subf %61, %60 : vector<32x128xf32>
    %63 = math.exp %62 : vector<32x128xf32>
    %c1_24 = arith.constant 1 : index
    %c0_25 = arith.constant 0 : index
    %c0_26 = arith.constant 0 : index
    %64 = vector.load %arg3[%c1_24, %c0_25, %c0_26] : memref<4x32x1xf32, #tpu.memory_space<vmem>>, vector<1x32x1xf32>
    %65 = vector.shape_cast %64 : vector<1x32x1xf32> to vector<32x1xf32>
    %66 = vector.broadcast %65 : vector<32x1xf32> to vector<32x128xf32>
    %67 = arith.mulf %66, %63 : vector<32x128xf32>
    %68 = arith.addf %36, %67 : vector<32x128xf32>
    %c6 = arith.constant 6 : index
    %c0_27 = arith.constant 0 : index
    %c0_28 = arith.constant 0 : index
    %69 = vector.load %arg2[%c6, %c0_27, %c0_28] : memref<12x32x1xf32, #tpu.memory_space<vmem>>, vector<1x32x1xf32>
    %70 = vector.shape_cast %69 : vector<1x32x1xf32> to vector<32x1xf32>
    %c6_29 = arith.constant 6 : index
    %71 = arith.index_cast %3 : i32 to index
    %72 = vector.load %arg1[%c6_29, %71] : memref<12x128xf32, #tpu.memory_space<vmem>>, vector<1x128xf32>
    %73 = vector.broadcast %70 : vector<32x1xf32> to vector<32x128xf32>
    %74 = vector.broadcast %72 : vector<1x128xf32> to vector<32x128xf32>
    %75 = arith.mulf %73, %74 : vector<32x128xf32>
    %c7 = arith.constant 7 : index
    %c0_30 = arith.constant 0 : index
    %c0_31 = arith.constant 0 : index
    %76 = vector.load %arg2[%c7, %c0_30, %c0_31] : memref<12x32x1xf32, #tpu.memory_space<vmem>>, vector<1x32x1xf32>
    %77 = vector.shape_cast %76 : vector<1x32x1xf32> to vector<32x1xf32>
    %c7_32 = arith.constant 7 : index
    %78 = arith.index_cast %3 : i32 to index
    %79 = vector.load %arg1[%c7_32, %78] : memref<12x128xf32, #tpu.memory_space<vmem>>, vector<1x128xf32>
    %80 = vector.broadcast %77 : vector<32x1xf32> to vector<32x128xf32>
    %81 = vector.broadcast %79 : vector<1x128xf32> to vector<32x128xf32>
    %82 = arith.mulf %80, %81 : vector<32x128xf32>
    %83 = arith.addf %75, %82 : vector<32x128xf32>
    %c8 = arith.constant 8 : index
    %c0_33 = arith.constant 0 : index
    %c0_34 = arith.constant 0 : index
    %84 = vector.load %arg2[%c8, %c0_33, %c0_34] : memref<12x32x1xf32, #tpu.memory_space<vmem>>, vector<1x32x1xf32>
    %85 = vector.shape_cast %84 : vector<1x32x1xf32> to vector<32x1xf32>
    %c8_35 = arith.constant 8 : index
    %86 = arith.index_cast %3 : i32 to index
    %87 = vector.load %arg1[%c8_35, %86] : memref<12x128xf32, #tpu.memory_space<vmem>>, vector<1x128xf32>
    %88 = vector.broadcast %85 : vector<32x1xf32> to vector<32x128xf32>
    %89 = vector.broadcast %87 : vector<1x128xf32> to vector<32x128xf32>
    %90 = arith.mulf %88, %89 : vector<32x128xf32>
    %91 = arith.addf %83, %90 : vector<32x128xf32>
    %92 = math.sqrt %91 : vector<32x128xf32>
    %cst_36 = arith.constant 0.000000e+00 : f32
    %93 = vector.broadcast %cst_36 : f32 to vector<32x128xf32>
    %94 = arith.subf %93, %92 : vector<32x128xf32>
    %95 = math.exp %94 : vector<32x128xf32>
    %c2_37 = arith.constant 2 : index
    %c0_38 = arith.constant 0 : index
    %c0_39 = arith.constant 0 : index
    %96 = vector.load %arg3[%c2_37, %c0_38, %c0_39] : memref<4x32x1xf32, #tpu.memory_space<vmem>>, vector<1x32x1xf32>
    %97 = vector.shape_cast %96 : vector<1x32x1xf32> to vector<32x1xf32>
    %98 = vector.broadcast %97 : vector<32x1xf32> to vector<32x128xf32>
    %99 = arith.mulf %98, %95 : vector<32x128xf32>
    %100 = arith.addf %68, %99 : vector<32x128xf32>
    %c9 = arith.constant 9 : index
    %c0_40 = arith.constant 0 : index
    %c0_41 = arith.constant 0 : index
    %101 = vector.load %arg2[%c9, %c0_40, %c0_41] : memref<12x32x1xf32, #tpu.memory_space<vmem>>, vector<1x32x1xf32>
    %102 = vector.shape_cast %101 : vector<1x32x1xf32> to vector<32x1xf32>
    %c9_42 = arith.constant 9 : index
    %103 = arith.index_cast %3 : i32 to index
    %104 = vector.load %arg1[%c9_42, %103] : memref<12x128xf32, #tpu.memory_space<vmem>>, vector<1x128xf32>
    %105 = vector.broadcast %102 : vector<32x1xf32> to vector<32x128xf32>
    %106 = vector.broadcast %104 : vector<1x128xf32> to vector<32x128xf32>
    %107 = arith.mulf %105, %106 : vector<32x128xf32>
    %c10 = arith.constant 10 : index
    %c0_43 = arith.constant 0 : index
    %c0_44 = arith.constant 0 : index
    %108 = vector.load %arg2[%c10, %c0_43, %c0_44] : memref<12x32x1xf32, #tpu.memory_space<vmem>>, vector<1x32x1xf32>
    %109 = vector.shape_cast %108 : vector<1x32x1xf32> to vector<32x1xf32>
    %c10_45 = arith.constant 10 : index
    %110 = arith.index_cast %3 : i32 to index
    %111 = vector.load %arg1[%c10_45, %110] : memref<12x128xf32, #tpu.memory_space<vmem>>, vector<1x128xf32>
    %112 = vector.broadcast %109 : vector<32x1xf32> to vector<32x128xf32>
    %113 = vector.broadcast %111 : vector<1x128xf32> to vector<32x128xf32>
    %114 = arith.mulf %112, %113 : vector<32x128xf32>
    %115 = arith.addf %107, %114 : vector<32x128xf32>
    %c11 = arith.constant 11 : index
    %c0_46 = arith.constant 0 : index
    %c0_47 = arith.constant 0 : index
    %116 = vector.load %arg2[%c11, %c0_46, %c0_47] : memref<12x32x1xf32, #tpu.memory_space<vmem>>, vector<1x32x1xf32>
    %117 = vector.shape_cast %116 : vector<1x32x1xf32> to vector<32x1xf32>
    %c11_48 = arith.constant 11 : index
    %118 = arith.index_cast %3 : i32 to index
    %119 = vector.load %arg1[%c11_48, %118] : memref<12x128xf32, #tpu.memory_space<vmem>>, vector<1x128xf32>
    %120 = vector.broadcast %117 : vector<32x1xf32> to vector<32x128xf32>
    %121 = vector.broadcast %119 : vector<1x128xf32> to vector<32x128xf32>
    %122 = arith.mulf %120, %121 : vector<32x128xf32>
    %123 = arith.addf %115, %122 : vector<32x128xf32>
    %124 = math.sqrt %123 : vector<32x128xf32>
    %cst_49 = arith.constant 0.000000e+00 : f32
    %125 = vector.broadcast %cst_49 : f32 to vector<32x128xf32>
    %126 = arith.subf %125, %124 : vector<32x128xf32>
    %127 = math.exp %126 : vector<32x128xf32>
    %c3_50 = arith.constant 3 : index
    %c0_51 = arith.constant 0 : index
    %c0_52 = arith.constant 0 : index
    %128 = vector.load %arg3[%c3_50, %c0_51, %c0_52] : memref<4x32x1xf32, #tpu.memory_space<vmem>>, vector<1x32x1xf32>
    %129 = vector.shape_cast %128 : vector<1x32x1xf32> to vector<32x1xf32>
    %130 = vector.broadcast %129 : vector<32x1xf32> to vector<32x128xf32>
    %131 = arith.mulf %130, %127 : vector<32x128xf32>
    %132 = arith.addf %100, %131 : vector<32x128xf32>
    %c0_53 = arith.constant 0 : index
    %133 = arith.index_cast %3 : i32 to index
    %134 = vector.load %arg4[%c0_53, %133] : memref<32x128xf32, #tpu.memory_space<vmem>>, vector<32x128xf32>
    tpu.vector_store %arg4[%c0_53, %133], %132 {strides = array<i32>} : memref<32x128xf32, #tpu.memory_space<vmem>>, vector<32x128xf32>,
    %c1_i32_54 = arith.constant 1 : i32
    return
  }
  func.func @transform_0(%arg0: i32) -> (i32, i32) {
    %c0_i32 = arith.constant 0 : i32
    %c0_i32_0 = arith.constant 0 : i32
    return %c0_i32, %arg0 : i32, i32
  }
  func.func @transform_1(%arg0: i32) -> (i32, i32, i32) {
    %c0_i32 = arith.constant 0 : i32
    %c0_i32_0 = arith.constant 0 : i32
    %c0_i32_1 = arith.constant 0 : i32
    %c0_i32_2 = arith.constant 0 : i32
    return %c0_i32, %c0_i32_0, %c0_i32_1 : i32, i32, i32
  }
  func.func @transform_2(%arg0: i32) -> (i32, i32, i32) {
    %c0_i32 = arith.constant 0 : i32
    %c0_i32_0 = arith.constant 0 : i32
    %c0_i32_1 = arith.constant 0 : i32
    %c0_i32_2 = arith.constant 0 : i32
    return %c0_i32, %c0_i32_0, %c0_i32_1 : i32, i32, i32
  }
  func.func @transform_3(%arg0: i32) -> (i32, i32) {
    %c0_i32 = arith.constant 0 : i32
    %c0_i32_0 = arith.constant 0 : i32
    return %c0_i32, %arg0 : i32, i32
  }
}

</mosaic_0001>

<bundles_post_ra>
// kernel: tpu_custom_call.1
= control target key start
LH: loop header
LB: loop body
LE: loop exit
PB: predicated region body
PF: predicated region fallthrough
CT: control target
= control target key end

     0   :  { %v927_v2 = vmov 0   ;;  %s1279_s0 = inlined_call_operand.vmem [shape: f32[12,128], index: 0, kind: input, shape index: {}]   ;;  %s1280_s1 = inlined_call_operand.vmem [shape: f32[12,32,1], index: 1, kind: input, shape index: {}]   ;;  %s1281_s2 = inlined_call_operand.vmem [shape: f32[4,32,1], index: 2, kind: input, shape index: {}]   ;;  %s1282_s3 = inlined_call_operand.hbm [shape: f32[32,128], index: 3, kind: output, shape index: {}]  }
   0x1   :  { %v17_v0 = vld [vmem:[%s1280_s1 + $0x10] sm:$0xff]  ;;  %v15_v1 = vld [vmem:[%s1280_s1] sm:$0xff]  ;;  %838 = vset.pattern.permute.xlu1 %v927_v2  ;;  %837 = vset.pattern.permute.xlu0 %v927_v2  ;;  %v18_v3 = vld [vmem:[%s1280_s1 + $0x18] sm:$0xff] }
   0x2   :  { %32 = vperm.xlu1 %838, %v17_v0   ;;  %22 = vperm.xlu0 %837, %v15_v1   ;;  %v16_v4 = vld [vmem:[%s1280_s1 + $0x8] sm:$0xff]  ;;  %v766_v6 = vld [vmem:[%s1280_s1 + $0x20] sm:$0xff]  ;;  %v769_v7 = vld [vmem:[%s1280_s1 + $0x38] sm:$0xff] }
   0x3   :  { %v767_v5 = vld [vmem:[%s1280_s1 + $0x28] sm:$0xff]  ;;  %v768_v8 = vld [vmem:[%s1280_s1 + $0x30] sm:$0xff]  ;;  %v771_v10 = vld [vmem:[%s1280_s1 + $0x40] sm:$0xff] }
   0x4   :  { %v772_v9 = vld [vmem:[%s1280_s1 + $0x48] sm:$0xff]  ;;  %v774_v11 = vld [vmem:[%s1280_s1 + $0x58] sm:$0xff]  ;;  %v773_v12 = vld [vmem:[%s1280_s1 + $0x50] sm:$0xff] }
   0x6   :  { %37 = vperm.xlu1 %838, %v18_v3   ;;  %27 = vperm.xlu0 %837, %v16_v4  }
   0xa   :  { %61 = vperm.xlu1 %838, %v767_v5   ;;  %56 = vperm.xlu0 %837, %v766_v6  }
   0xe   :  { %71 = vperm.xlu1 %838, %v769_v7   ;;  %66 = vperm.xlu0 %837, %v768_v8  }
  0x12   :  { %99 = vperm.xlu1 %838, %v772_v9   ;;  %94 = vperm.xlu0 %837, %v771_v10  }
  0x16   :  { %109 = vperm.xlu1 %838, %v774_v11   ;;  %104 = vperm.xlu0 %837, %v773_v12  }
  0x17   :  { %8 = vsyncpa [#allocation3], 0  ;;  %v165_v13 = vld [vmem:[%s1281_s2 + $0x8] sm:$0xff]  ;;  %v164_v14 = vld [vmem:[%s1281_s2] sm:$0xff] }
  0x18   :  { %v167_v15 = vld [vmem:[%s1281_s2 + $0x18] sm:$0xff]  ;;  %v166_v16 = vld [vmem:[%s1281_s2 + $0x10] sm:$0xff]  ;;  %v777_v17 = vld [vmem:[%s1280_s1 + $0x68] sm:$0xff] }
  0x19   :  { %v776_v18 = vld [vmem:[%s1280_s1 + $0x60] sm:$0xff]  ;;  %v779_v19 = vld [vmem:[%s1280_s1 + $0x78] sm:$0xff]  ;;  %v778_v20 = vld [vmem:[%s1280_s1 + $0x70] sm:$0xff] }
  0x1a   :  { %175 = vperm.xlu1 %838, %v165_v13   ;;  %170 = vperm.xlu0 %837, %v164_v14   ;;  %v782_v21 = vld [vmem:[%s1280_s1 + $0x88] sm:$0xff]  ;;  %v781_v22 = vld [vmem:[%s1280_s1 + $0x80] sm:$0xff]  ;;  %v784_v23 = vld [vmem:[%s1280_s1 + $0x98] sm:$0xff] }
  0x1b   :  { %v783_v24 = vld [vmem:[%s1280_s1 + $0x90] sm:$0xff]  ;;  %v787_v25 = vld [vmem:[%s1280_s1 + $0xa8] sm:$0xff]  ;;  %v786_v26 = vld [vmem:[%s1280_s1 + $0xa0] sm:$0xff] }
  0x1c   :  { %v789_v27 = vld [vmem:[%s1280_s1 + $0xb8] sm:$0xff]  ;;  %v788_v28 = vld [vmem:[%s1280_s1 + $0xb0] sm:$0xff]  ;;  %v792_v29 = vld [vmem:[%s1281_s2 + $0x28] sm:$0xff] }
  0x1d   :  { %v791_v30 = vld [vmem:[%s1281_s2 + $0x20] sm:$0xff]  ;;  %v794_v31 = vld [vmem:[%s1281_s2 + $0x38] sm:$0xff]  ;;  %v793_v32 = vld [vmem:[%s1281_s2 + $0x30] sm:$0xff] }
  0x1e   :  { %185 = vperm.xlu1 %838, %v167_v15   ;;  %180 = vperm.xlu0 %837, %v166_v16   ;;  %v796_v33 = vld [vmem:[%s1280_s1 + $0xc8] sm:$0xff]  ;;  %v795_v34 = vld [vmem:[%s1280_s1 + $0xc0] sm:$0xff]  ;;  %v798_v35 = vld [vmem:[%s1280_s1 + $0xd8] sm:$0xff] }
  0x1f   :  { %v797_v36 = vld [vmem:[%s1280_s1 + $0xd0] sm:$0xff]  ;;  %v801_v37 = vld [vmem:[%s1280_s1 + $0xe8] sm:$0xff]  ;;  %v800_v38 = vld [vmem:[%s1280_s1 + $0xe0] sm:$0xff] }
  0x20   :  { %v803_v39 = vld [vmem:[%s1280_s1 + $0xf8] sm:$0xff]  ;;  %v802_v40 = vld [vmem:[%s1280_s1 + $0xf0] sm:$0xff]  ;;  %v806_v41 = vld [vmem:[%s1280_s1 + $0x108] sm:$0xff] }
  0x21   :  { %v805_v42 = vld [vmem:[%s1280_s1 + $0x100] sm:$0xff]  ;;  %v808_v43 = vld [vmem:[%s1280_s1 + $0x118] sm:$0xff]  ;;  %v807_v44 = vld [vmem:[%s1280_s1 + $0x110] sm:$0xff] }
  0x22   :  { %209 = vperm.xlu1 %838, %v777_v17   ;;  %204 = vperm.xlu0 %837, %v776_v18   ;;  %v815_v45 = vld [vmem:[%s1280_s1 + $0x128] sm:$0xff]  ;;  %v814_v46 = vld [vmem:[%s1280_s1 + $0x120] sm:$0xff]  ;;  %v817_v47 = vld [vmem:[%s1280_s1 + $0x138] sm:$0xff] }
  0x23   :  { %v816_v48 = vld [vmem:[%s1280_s1 + $0x130] sm:$0xff]  ;;  %v820_v49 = vld [vmem:[%s1280_s1 + $0x148] sm:$0xff]  ;;  %v819_v50 = vld [vmem:[%s1280_s1 + $0x140] sm:$0xff] }
  0x24   :  { %v822_v51 = vld [vmem:[%s1280_s1 + $0x158] sm:$0xff]  ;;  %v821_v52 = vld [vmem:[%s1280_s1 + $0x150] sm:$0xff]  ;;  %v825_v53 = vld [vmem:[%s1280_s1 + $0x168] sm:$0xff] }
  0x25   :  { %v824_v54 = vld [vmem:[%s1280_s1 + $0x160] sm:$0xff]  ;;  %v827_v55 = vld [vmem:[%s1280_s1 + $0x178] sm:$0xff]  ;;  %v826_v56 = vld [vmem:[%s1280_s1 + $0x170] sm:$0xff] }
  0x26   :  { %219 = vperm.xlu1 %838, %v779_v19   ;;  %214 = vperm.xlu0 %837, %v778_v20   ;;  %v811_v57 = vld [vmem:[%s1281_s2 + $0x48] sm:$0xff]  ;;  %v810_v58 = vld [vmem:[%s1281_s2 + $0x40] sm:$0xff]  ;;  %v813_v59 = vld [vmem:[%s1281_s2 + $0x58] sm:$0xff] }
  0x27   :  { %v812_v60 = vld [vmem:[%s1281_s2 + $0x50] sm:$0xff]  ;;  %v830_v61 = vld [vmem:[%s1281_s2 + $0x68] sm:$0xff]  ;;  %v829_v62 = vld [vmem:[%s1281_s2 + $0x60] sm:$0xff] }
  0x28   :  { %v832_v63 = vld [vmem:[%s1281_s2 + $0x78] sm:$0xff]  ;;  %v831_v0 = vld [vmem:[%s1281_s2 + $0x70] sm:$0xff]  ;;  %v765_v5 = vld [vmem:[%s1279_s0] ss:$0 sm:$0xff] }
  0x29   :  { %v770_v6 = vld [vmem:[%s1279_s0 + $0x1] ss:$0 sm:$0xff] }
  0x2a   :  { %243 = vperm.xlu1 %838, %v782_v21   ;;  %238 = vperm.xlu0 %837, %v781_v22   ;;  %v775_v21 = vld [vmem:[%s1279_s0 + $0x2] ss:$0 sm:$0xff] }
  0x2e   :  { %253 = vperm.xlu1 %838, %v784_v23   ;;  %248 = vperm.xlu0 %837, %v783_v24  }
  0x32   :  { %281 = vperm.xlu1 %838, %v787_v25   ;;  %276 = vperm.xlu0 %837, %v786_v26  }
  0x36   :  { %291 = vperm.xlu1 %838, %v789_v27   ;;  %286 = vperm.xlu0 %837, %v788_v28  }
  0x3a   :  { %358 = vperm.xlu1 %838, %v792_v29   ;;  %353 = vperm.xlu0 %837, %v791_v30  }
  0x3e   :  { %368 = vperm.xlu1 %838, %v794_v31   ;;  %363 = vperm.xlu0 %837, %v793_v32  }
  0x42   :  { %392 = vperm.xlu1 %838, %v796_v33   ;;  %387 = vperm.xlu0 %837, %v795_v34  }
  0x46   :  { %402 = vperm.xlu1 %838, %v798_v35   ;;  %397 = vperm.xlu0 %837, %v797_v36  }
  0x4a   :  { %426 = vperm.xlu1 %838, %v801_v37   ;;  %421 = vperm.xlu0 %837, %v800_v38  }
  0x4e   :  { %436 = vperm.xlu1 %838, %v803_v39   ;;  %431 = vperm.xlu0 %837, %v802_v40  }
  0x52   :  { %464 = vperm.xlu1 %838, %v806_v41   ;;  %459 = vperm.xlu0 %837, %v805_v42  }
  0x56   :  { %474 = vperm.xlu1 %838, %v808_v43   ;;  %469 = vperm.xlu0 %837, %v807_v44  }
  0x5a   :  { %575 = vperm.xlu1 %838, %v815_v45   ;;  %570 = vperm.xlu0 %837, %v814_v46  }
  0x5e   :  { %585 = vperm.xlu1 %838, %v817_v47   ;;  %580 = vperm.xlu0 %837, %v816_v48  }
  0x62   :  { %609 = vperm.xlu1 %838, %v820_v49   ;;  %604 = vperm.xlu0 %837, %v819_v50  }
  0x66   :  { %619 = vperm.xlu1 %838, %v822_v51   ;;  %614 = vperm.xlu0 %837, %v821_v52  }
  0x6a   :  { %647 = vperm.xlu1 %838, %v825_v53   ;;  %642 = vperm.xlu0 %837, %v824_v54  }
  0x6e   :  { %657 = vperm.xlu1 %838, %v827_v55   ;;  %652 = vperm.xlu0 %837, %v826_v56  }
  0x72   :  { %541 = vperm.xlu1 %838, %v811_v57   ;;  %536 = vperm.xlu0 %837, %v810_v58  }
  0x76   :  { %551 = vperm.xlu1 %838, %v813_v59   ;;  %546 = vperm.xlu0 %837, %v812_v60  }
  0x7a   :  { %724 = vperm.xlu1 %838, %v830_v61   ;;  %719 = vperm.xlu0 %837, %v829_v62  }
  0x7e   :  { %734 = vperm.xlu1 %838, %v832_v63   ;;  %729 = vperm.xlu0 %837, %v831_v0  }
  0x81   :  { %v33_v1 = vpop.permute.xlu1 %32  ;;  %v23_v2 = vpop.permute.xlu0 %22 }
  0x82   :  { %v44_v9 = vmul.f32 %v765_v5, %v23_v2  ;;  %v46_v17 = vmul.f32 %v765_v5, %v33_v1 }
  0x85   :  { %v38_v3 = vpop.permute.xlu1 %37  ;;  %v28_v4 = vpop.permute.xlu0 %27 }
  0x86   :  { %v45_v10 = vmul.f32 %v765_v5, %v28_v4  ;;  %v47_v18 = vmul.f32 %v765_v5, %v38_v3 }
  0x89   :  { %v62_v7 = vpop.permute.xlu1 %61  ;;  %v57_v8 = vpop.permute.xlu0 %56 }
  0x8a   :  { %v79_v11 = vmul.f32 %v770_v6, %v62_v7  ;;  %v78_v12 = vmul.f32 %v770_v6, %v57_v8  ;;  %v785_v8 = vld [vmem:[%s1279_s0 + $0x4] ss:$0 sm:$0xff] }
  0x8c   :  { %v83_v13 = vadd.f32 %v79_v11, %v45_v10  ;;  %v82_v14 = vadd.f32 %v78_v12, %v44_v9  ;;  %v780_v11 = vld [vmem:[%s1279_s0 + $0x3] ss:$0 sm:$0xff] }
  0x8d   :  { %v72_v15 = vpop.permute.xlu1 %71  ;;  %v67_v16 = vpop.permute.xlu0 %66 }
  0x8e   :  { %v81_v19 = vmul.f32 %v770_v6, %v72_v15  ;;  %v80_v20 = vmul.f32 %v770_v6, %v67_v16 }
  0x90   :  { %v85_v22 = vadd.f32 %v81_v19, %v47_v18  ;;  %v84_v23 = vadd.f32 %v80_v20, %v46_v17  ;;  %v790_v17 = vld [vmem:[%s1279_s0 + $0x5] ss:$0 sm:$0xff] }
  0x91   :  { %v100_v24 = vpop.permute.xlu1 %99  ;;  %v95_v25 = vpop.permute.xlu0 %94 }
  0x92   :  { %v117_v26 = vmul.f32 %v775_v21, %v100_v24  ;;  %v116_v27 = vmul.f32 %v775_v21, %v95_v25 }
  0x94   :  { %v121_v28 = vadd.f32 %v117_v26, %v83_v13  ;;  %v120_v29 = vadd.f32 %v116_v27, %v82_v14 }
  0x95   :  { %v110_v30 = vpop.permute.xlu1 %109  ;;  %v105_v31 = vpop.permute.xlu0 %104 }
  0x96   :  { %839 = vrsqrt.f32 %v121_v28  ;;  %v119_v32 = vmul.f32 %v775_v21, %v110_v30  ;;  %v118_v33 = vmul.f32 %v775_v21, %v105_v31  ;;  %vm133_vm0 = vcmp.eq.f32.partialorder %v121_v28, inf }
  0x97   :  { %841 = vrsqrt.f32 %v120_v29  ;;  %v136_v45 = vand.u32 2147483648, %v121_v28  ;;  %vm135_vm1 = vcmp.eq.f32.partialorder %v121_v28, 0.0  ;;  %vm126_vm2 = vcmp.eq.f32.partialorder %v120_v29, inf }
  0x98   :  { %v123_v34 = vadd.f32 %v119_v32, %v85_v22  ;;  %v122_v35 = vadd.f32 %v118_v33, %v84_v23  ;;  %v129_v48 = vand.u32 2147483648, %v120_v29  ;;  %vm128_vm3 = vcmp.eq.f32.partialorder %v120_v29, 0.0 }
  0x99   :  { %v1152_v36 = vpop.permute.xlu1 %175  ;;  %v1154_v37 = vpop.permute.xlu0 %170 }
  0x9a   :  { %843 = vrsqrt.f32 %v123_v34  ;;  %vm147_vm4 = vcmp.eq.f32.partialorder %v123_v34, inf  ;;  %vm149_vm5 = vcmp.eq.f32.partialorder %v123_v34, 0.0  ;;  %v150_v59 = vand.u32 2147483648, %v123_v34 }
  0x9b   :  { %845 = vrsqrt.f32 %v122_v35  ;;  %vm140_vm6 = vcmp.eq.f32.partialorder %v122_v35, inf  ;;  %v143_v63 = vand.u32 2147483648, %v122_v35  ;;  %vm142_vm7 = vcmp.eq.f32.partialorder %v122_v35, 0.0 }
  0x9d   :  { %v1156_v38 = vpop.permute.xlu1 %185  ;;  %v1158_v39 = vpop.permute.xlu0 %180 }
  0xa0   :  { %v840_v40 = vpop.eup %839 }
  0xa1   :  { %v842_v41 = vpop.eup %841  ;;  %v132_v42 = vmul.f32 %v840_v40, %v121_v28  ;;  %v210_v43 = vpop.permute.xlu1 %209 }
  0xa2   :  { %v205_v44 = vpop.permute.xlu0 %204  ;;  %v125_v46 = vmul.f32 %v842_v41, %v120_v29  ;;  %v227_v16 = vmul.f32 %v780_v11, %v210_v43 }
  0xa3   :  { %v134_v47 = vsel %vm133_vm0, %v121_v28, %v132_v42  ;;  %v226_v18 = vmul.f32 %v780_v11, %v205_v44 }
  0xa4   :  { %v844_v49 = vpop.eup %843  ;;  %v137_v50 = vsel %vm135_vm1, %v136_v45, %v134_v47  ;;  %v127_v51 = vsel %vm126_vm2, %v120_v29, %v125_v46 }
  0xa5   :  { %v846_v52 = vpop.eup %845  ;;  %v153_v53 = vsub.f32 0.0, %v137_v50  ;;  %v130_v54 = vsel %vm128_vm3, %v129_v48, %v127_v51  ;;  %v146_v55 = vmul.f32 %v844_v49, %v123_v34  ;;  %v220_v56 = vpop.permute.xlu1 %219 }
  0xa6   :  { %v215_v57 = vpop.permute.xlu0 %214  ;;  %v152_v58 = vsub.f32 0.0, %v130_v54  ;;  %v139_v60 = vmul.f32 %v846_v52, %v122_v35  ;;  %v229_v28 = vmul.f32 %v780_v11, %v220_v56 }
  0xa7   :  { %v158_v61 = vmul.f32 1.442695, %v153_v53  ;;  %v148_v62 = vsel %vm147_vm4, %v123_v34, %v146_v55  ;;  %v228_v31 = vmul.f32 %v780_v11, %v215_v57 }
  0xa8   :  { %v156_v0 = vmul.f32 1.442695, %v152_v58  ;;  %v151_v1 = vsel %vm149_vm5, %v150_v59, %v148_v62  ;;  %v141_v2 = vsel %vm140_vm6, %v122_v35, %v139_v60 }
  0xa9   :  { %847 = vpow2.f32 %v158_v61  ;;  %v155_v3 = vsub.f32 0.0, %v151_v1  ;;  %v144_v4 = vsel %vm142_vm7, %v143_v63, %v141_v2  ;;  %v244_v5 = vpop.permute.xlu1 %243 }
  0xaa   :  { %v239_v6 = vpop.permute.xlu0 %238  ;;  %849 = vpow2.f32 %v156_v0  ;;  %v154_v7 = vsub.f32 0.0, %v144_v4  ;;  %v261_v12 = vmul.f32 %v785_v8, %v244_v5 }
  0xab   :  { %v162_v9 = vmul.f32 1.442695, %v155_v3  ;;  %v260_v15 = vmul.f32 %v785_v8, %v239_v6 }
  0xac   :  { %v160_v10 = vmul.f32 1.442695, %v154_v7  ;;  %v265_v19 = vadd.f32 %v261_v12, %v227_v16 }
  0xad   :  { %851 = vpow2.f32 %v162_v9  ;;  %v254_v13 = vpop.permute.xlu1 %253  ;;  %v264_v23 = vadd.f32 %v260_v15, %v226_v18 }
  0xae   :  { %v249_v14 = vpop.permute.xlu0 %248  ;;  %853 = vpow2.f32 %v160_v10  ;;  %v263_v20 = vmul.f32 %v785_v8, %v254_v13 }
  0xaf   :  { %v262_v24 = vmul.f32 %v785_v8, %v249_v14 }
  0xb0   :  { %v267_v35 = vadd.f32 %v263_v20, %v229_v28  ;;  %v804_v20 = vld [vmem:[%s1279_s0 + $0x7] ss:$0 sm:$0xff] }
  0xb1   :  { %v282_v21 = vpop.permute.xlu1 %281  ;;  %v266_v42 = vadd.f32 %v262_v24, %v228_v31 }
  0xb2   :  { %v277_v22 = vpop.permute.xlu0 %276  ;;  %v299_v25 = vmul.f32 %v790_v17, %v282_v21 }
  0xb3   :  { %v298_v26 = vmul.f32 %v790_v17, %v277_v22  ;;  %v848_v27 = vpop.eup %847  ;;  %v799_v22 = vld [vmem:[%s1279_s0 + $0x6] ss:$0 sm:$0xff] }
  0xb4   :  { %v850_v29 = vpop.eup %849  ;;  %v1170_v30 = vmul.f32 %v848_v27, %v1152_v36  ;;  %v303_v32 = vadd.f32 %v299_v25, %v265_v19  ;;  %v809_v27 = vld [vmem:[%s1279_s0 + $0x8] ss:$0 sm:$0xff] }
  0xb5   :  { %v302_v33 = vadd.f32 %v298_v26, %v264_v23  ;;  %v1173_v34 = vmul.f32 %v850_v29, %v1154_v37  ;;  %v292_v40 = vpop.permute.xlu1 %291 }
  0xb6   :  { %v287_v41 = vpop.permute.xlu0 %286  ;;  %855 = vrsqrt.f32 %v303_v32  ;;  %v301_v43 = vmul.f32 %v790_v17, %v292_v40  ;;  %vm315_vm8 = vcmp.eq.f32.partialorder %v303_v32, inf  ;;  %v318_v57 = vand.u32 2147483648, %v303_v32 }
  0xb7   :  { %v300_v44 = vmul.f32 %v790_v17, %v287_v41  ;;  %v852_v45 = vpop.eup %851  ;;  %857 = vrsqrt.f32 %v302_v33  ;;  %vm317_vm9 = vcmp.eq.f32.partialorder %v303_v32, 0.0  ;;  %vm308_vm10 = vcmp.eq.f32.partialorder %v302_v33, inf }
  0xb8   :  { %v854_v46 = vpop.eup %853  ;;  %v1176_v47 = vmul.f32 %v852_v45, %v1156_v38  ;;  %v305_v36 = vadd.f32 %v301_v43, %v267_v35  ;;  %v311_v59 = vand.u32 2147483648, %v302_v33  ;;  %vm310_vm11 = vcmp.eq.f32.partialorder %v302_v33, 0.0 }
  0xb9   :  { %v304_v48 = vadd.f32 %v300_v44, %v266_v42  ;;  %v1179_v49 = vmul.f32 %v854_v46, %v1158_v39  ;;  %v1181_v37 = vpop.permute.xlu1 %358 }
  0xba   :  { %v1183_v50 = vpop.permute.xlu0 %353  ;;  %859 = vrsqrt.f32 %v305_v36  ;;  %vm329_vm12 = vcmp.eq.f32.partialorder %v305_v36, inf  ;;  %vm331_vm13 = vcmp.eq.f32.partialorder %v305_v36, 0.0  ;;  %v332_v6 = vand.u32 2147483648, %v305_v36 }
  0xbb   :  { %861 = vrsqrt.f32 %v304_v48  ;;  %vm322_vm14 = vcmp.eq.f32.partialorder %v304_v48, inf  ;;  %v325_v10 = vand.u32 2147483648, %v304_v48  ;;  %vm324_vm15 = vcmp.eq.f32.partialorder %v304_v48, 0.0 }
  0xbd   :  { %v1185_v51 = vpop.permute.xlu1 %368 }
  0xbe   :  { %v1187_v52 = vpop.permute.xlu0 %363 }
  0xc0   :  { %v856_v53 = vpop.eup %855 }
  0xc1   :  { %v858_v54 = vpop.eup %857  ;;  %v314_v55 = vmul.f32 %v856_v53, %v303_v32  ;;  %v393_v38 = vpop.permute.xlu1 %392 }
  0xc2   :  { %v388_v56 = vpop.permute.xlu0 %387  ;;  %v307_v58 = vmul.f32 %v858_v54, %v302_v33  ;;  %v410_v28 = vmul.f32 %v799_v22, %v393_v38 }
  0xc3   :  { %v316_v39 = vsel %vm315_vm8, %v303_v32, %v314_v55  ;;  %v409_v29 = vmul.f32 %v799_v22, %v388_v56 }
  0xc4   :  { %v860_v60 = vpop.eup %859  ;;  %v319_v61 = vsel %vm317_vm9, %v318_v57, %v316_v39  ;;  %v309_v62 = vsel %vm308_vm10, %v302_v33, %v307_v58 }
  0xc5   :  { %v862_v63 = vpop.eup %861  ;;  %v335_v0 = vsub.f32 0.0, %v319_v61  ;;  %v312_v1 = vsel %vm310_vm11, %v311_v59, %v309_v62  ;;  %v328_v2 = vmul.f32 %v860_v60, %v305_v36  ;;  %v403_v3 = vpop.permute.xlu1 %402 }
  0xc6   :  { %v398_v4 = vpop.permute.xlu0 %397  ;;  %v334_v5 = vsub.f32 0.0, %v312_v1  ;;  %v321_v7 = vmul.f32 %v862_v63, %v304_v48 }
  0xc7   :  { %v340_v8 = vmul.f32 1.442695, %v335_v0  ;;  %v330_v9 = vsel %vm329_vm12, %v305_v36, %v328_v2  ;;  %v412_v36 = vmul.f32 %v799_v22, %v403_v3  ;;  %v411_v54 = vmul.f32 %v799_v22, %v398_v4 }
  0xc8   :  { %v338_v11 = vmul.f32 1.442695, %v334_v5  ;;  %v333_v12 = vsel %vm331_vm13, %v332_v6, %v330_v9  ;;  %v323_v13 = vsel %vm322_vm14, %v304_v48, %v321_v7  ;;  %v823_v7 = vld [vmem:[%s1279_s0 + $0xa] ss:$0 sm:$0xff] }
  0xc9   :  { %863 = vpow2.f32 %v340_v8  ;;  %v337_v14 = vsub.f32 0.0, %v333_v12  ;;  %v326_v15 = vsel %vm324_vm15, %v325_v10, %v323_v13  ;;  %v427_v16 = vpop.permute.xlu1 %426 }
  0xca   :  { %v422_v17 = vpop.permute.xlu0 %421  ;;  %865 = vpow2.f32 %v338_v11  ;;  %v336_v18 = vsub.f32 0.0, %v326_v15  ;;  %v444_v25 = vmul.f32 %v804_v20, %v427_v16 }
  0xcb   :  { %v344_v19 = vmul.f32 1.442695, %v337_v14  ;;  %v443_v26 = vmul.f32 %v804_v20, %v422_v17 }
  0xcc   :  { %v342_v21 = vmul.f32 1.442695, %v336_v18  ;;  %v448_v33 = vadd.f32 %v444_v25, %v410_v28 }
  0xcd   :  { %867 = vpow2.f32 %v344_v19  ;;  %v437_v23 = vpop.permute.xlu1 %436  ;;  %v447_v43 = vadd.f32 %v443_v26, %v409_v29  ;;  %v828_v19 = vld [vmem:[%s1279_s0 + $0xb] ss:$0 sm:$0xff] }
  0xce   :  { %v432_v24 = vpop.permute.xlu0 %431  ;;  %869 = vpow2.f32 %v342_v21  ;;  %v446_v35 = vmul.f32 %v804_v20, %v437_v23 }
  0xcf   :  { %v445_v44 = vmul.f32 %v804_v20, %v432_v24 }
  0xd0   :  { %v450_v58 = vadd.f32 %v446_v35, %v412_v36 }
  0xd1   :  { %v465_v31 = vpop.permute.xlu1 %464 }
  0xd2   :  { %v460_v32 = vpop.permute.xlu0 %459  ;;  %v482_v40 = vmul.f32 %v809_v27, %v465_v31 }
  0xd3   :  { %v481_v41 = vmul.f32 %v809_v27, %v460_v32  ;;  %v864_v42 = vpop.eup %863 }
  0xd4   :  { %v866_v45 = vpop.eup %865  ;;  %v372_v46 = vmul.f32 %v864_v42, %v1181_v37  ;;  %v1199_v48 = vadd.f32 %v482_v40, %v448_v33  ;;  %v449_v37 = vadd.f32 %v445_v44, %v411_v54 }
  0xd5   :  { %v371_v53 = vmul.f32 %v866_v45, %v1183_v50  ;;  %v1202_v55 = vadd.f32 %v481_v41, %v447_v43  ;;  %v475_v38 = vpop.permute.xlu1 %474 }
  0xd6   :  { %v470_v56 = vpop.permute.xlu0 %469  ;;  %v1205_v57 = vadd.f32 %v372_v46, %v1170_v30  ;;  %v484_v39 = vmul.f32 %v809_v27, %v475_v38  ;;  %871 = vrsqrt.f32 %v1199_v48  ;;  %vm498_vm0 = vcmp.eq.f32.partialorder %v1199_v48, inf }
  0xd7   :  { %v483_v59 = vmul.f32 %v809_v27, %v470_v56  ;;  %v868_v60 = vpop.eup %867  ;;  %v1208_v61 = vadd.f32 %v371_v53, %v1173_v34  ;;  %873 = vrsqrt.f32 %v1202_v55  ;;  %vm500_vm1 = vcmp.eq.f32.partialorder %v1199_v48, 0.0 }
  0xd8   :  { %v870_v62 = vpop.eup %869  ;;  %v374_v50 = vmul.f32 %v868_v60, %v1185_v51  ;;  %v1212_v63 = vadd.f32 %v484_v39, %v450_v58  ;;  %v501_v14 = vand.u32 2147483648, %v1199_v48  ;;  %vm491_vm2 = vcmp.eq.f32.partialorder %v1202_v55, inf }
  0xd9   :  { %v373_v0 = vmul.f32 %v870_v62, %v1187_v52  ;;  %v1216_v30 = vadd.f32 %v483_v59, %v449_v37  ;;  %v576_v1 = vpop.permute.xlu1 %575  ;;  %vm493_vm3 = vcmp.eq.f32.partialorder %v1202_v55, 0.0  ;;  %v494_v21 = vand.u32 2147483648, %v1202_v55 }
  0xda   :  { %v571_v2 = vpop.permute.xlu0 %570  ;;  %v1219_v3 = vadd.f32 %v374_v50, %v1176_v47  ;;  %875 = vrsqrt.f32 %v1212_v63  ;;  %v818_v47 = vld [vmem:[%s1279_s0 + $0x9] ss:$0 sm:$0xff]  ;;  %vm512_vm4 = vcmp.eq.f32.partialorder %v1212_v63, inf  ;;  %vm514_vm5 = vcmp.eq.f32.partialorder %v1212_v63, 0.0  ;;  %s928_s0 = smov [#allocation2]  }
  0xdb   :  { %v1222_v34 = vadd.f32 %v373_v0, %v1179_v49  ;;  %877 = vrsqrt.f32 %v1216_v30  ;;  %v593_v17 = vmul.f32 %v818_v47, %v576_v1  ;;  %v592_v18 = vmul.f32 %v818_v47, %v571_v2  ;;  %s754_s26 = sshll.u32 %s928_s0, 4  ;;  %s755_s26 = int_to_ptr.vmem [resolvable:$true] %s754_s26 }
  0xdc   :  { %v515_v41 = vand.u32 2147483648, %v1212_v63  ;;  %vm505_vm6 = vcmp.eq.f32.partialorder %v1216_v30, inf  ;;  %v508_v60 = vand.u32 2147483648, %v1216_v30  ;;  %vm507_vm7 = vcmp.eq.f32.partialorder %v1216_v30, 0.0  ;;  %s903_s27 = scalar_lea.vmem %s755_s26, 512  ;;  %p908_p1 = scmp.lt.s32.totalorder %s755_s26, %s755_s26 }
  0xdd   :  { %v586_v51 = vpop.permute.xlu1 %585  ;;  %p904_p0 = scmp.ne.s32.totalorder %s755_s26, %s903_s27  ;;  %p909_p2 = scmp.lt.s32.totalorder %s903_s27, %s903_s27 }
  0xde   :  { %v581_v4 = vpop.permute.xlu0 %580  ;;  %v595_v35 = vmul.f32 %v818_v47, %v586_v51 }
  0xdf   :  { %v594_v40 = vmul.f32 %v818_v47, %v581_v4  ;;  %p910_p3 = por %p909_p2, %p908_p1 }
  0xe0   :  { %v872_v5 = vpop.eup %871 }
  0xe1   :  { %v610_v52 = vpop.permute.xlu1 %609  ;;  %v874_v8 = vpop.eup %873  ;;  %v497_v49 = vmul.f32 %v872_v5, %v1199_v48  ;;  %p911_p4 = pnand %p910_p3, %p904_p0 }
  0xe2   :  { %v605_v6 = vpop.permute.xlu0 %604  ;;  %v627_v10 = vmul.f32 %v823_v7, %v610_v52  ;;  %v490_v15 = vmul.f32 %v874_v8, %v1202_v55 }
  0xe3   :  { %v626_v11 = vmul.f32 %v823_v7, %v605_v6  ;;  %v499_v20 = vsel %vm498_vm0, %v1199_v48, %v497_v49 }
  0xe4   :  { %v876_v9 = vpop.eup %875  ;;  %v631_v23 = vadd.f32 %v627_v10, %v593_v17  ;;  %v492_v32 = vsel %vm491_vm2, %v1202_v55, %v490_v15  ;;  %v502_v54 = vsel %vm500_vm1, %v501_v14, %v499_v20 }
  0xe5   :  { %v620_v12 = vpop.permute.xlu1 %619  ;;  %v878_v16 = vpop.eup %877  ;;  %v511_v22 = vmul.f32 %v876_v9, %v1212_v63  ;;  %v630_v24 = vadd.f32 %v626_v11, %v592_v18  ;;  %v495_v38 = vsel %vm493_vm3, %v494_v21, %v492_v32  ;;  %v518_v50 = vsub.f32 0.0, %v502_v54 }
  0xe6   :  { %v615_v13 = vpop.permute.xlu0 %614  ;;  %v629_v25 = vmul.f32 %v823_v7, %v620_v12  ;;  %v504_v33 = vmul.f32 %v878_v16, %v1216_v30  ;;  %v517_v48 = vsub.f32 0.0, %v495_v38 }
  0xe7   :  { %v628_v26 = vmul.f32 %v823_v7, %v615_v13  ;;  %v513_v44 = vsel %vm512_vm4, %v1212_v63, %v511_v22  ;;  %v523_v1 = vmul.f32 1.442695, %v518_v50 }
  0xe8   :  { %v633_v45 = vadd.f32 %v629_v25, %v595_v35  ;;  %v506_v39 = vsel %vm505_vm6, %v1216_v30, %v504_v33  ;;  %v516_v59 = vsel %vm514_vm5, %v515_v41, %v513_v44  ;;  %v521_v51 = vmul.f32 1.442695, %v517_v48 }
  0xe9   :  { %v648_v27 = vpop.permute.xlu1 %647  ;;  %v632_v46 = vadd.f32 %v628_v26, %v594_v40  ;;  %v509_v0 = vsel %vm507_vm7, %v508_v60, %v506_v39  ;;  %v520_v55 = vsub.f32 0.0, %v516_v59 }
  0xea   :  { %v643_v28 = vpop.permute.xlu0 %642  ;;  %v665_v29 = vmul.f32 %v828_v19, %v648_v27  ;;  %v519_v2 = vsub.f32 0.0, %v509_v0 }
  0xeb   :  { %v664_v31 = vmul.f32 %v828_v19, %v643_v28  ;;  %v527_v4 = vmul.f32 1.442695, %v520_v55 }
  0xec   :  { %v669_v42 = vadd.f32 %v665_v29, %v631_v23  ;;  %v525_v63 = vmul.f32 1.442695, %v519_v2 }
  0xed   :  { %v668_v43 = vadd.f32 %v664_v31, %v630_v24  ;;  %v658_v36 = vpop.permute.xlu1 %657 }
  0xee   :  { %v653_v53 = vpop.permute.xlu0 %652  ;;  %879 = vrsqrt.f32 %v669_v42  ;;  %v667_v56 = vmul.f32 %v828_v19, %v658_v36  ;;  %vm681_vm8 = vcmp.eq.f32.partialorder %v669_v42, inf  ;;  %v684_v7 = vand.u32 2147483648, %v669_v42 }
  0xef   :  { %v666_v58 = vmul.f32 %v828_v19, %v653_v53  ;;  %881 = vrsqrt.f32 %v668_v43  ;;  %vm683_vm9 = vcmp.eq.f32.partialorder %v669_v42, 0.0  ;;  %vm674_vm10 = vcmp.eq.f32.partialorder %v668_v43, inf }
  0xf0   :  { %v671_v37 = vadd.f32 %v667_v56, %v633_v45  ;;  %v677_v47 = vand.u32 2147483648, %v668_v43  ;;  %vm676_vm11 = vcmp.eq.f32.partialorder %v668_v43, 0.0 }
  0xf1   :  { %v670_v62 = vadd.f32 %v666_v58, %v632_v46  ;;  %v542_v12 = vpop.permute.xlu1 %541 }
  0xf2   :  { %883 = vrsqrt.f32 %v671_v37  ;;  %vm695_vm12 = vcmp.eq.f32.partialorder %v671_v37, inf  ;;  %v537_v16 = vpop.permute.xlu0 %536  ;;  %vm697_vm13 = vcmp.eq.f32.partialorder %v671_v37, 0.0  ;;  %v698_v18 = vand.u32 2147483648, %v671_v37 }
  0xf3   :  { %885 = vrsqrt.f32 %v670_v62  ;;  %vm688_vm14 = vcmp.eq.f32.partialorder %v670_v62, inf  ;;  %v691_v22 = vand.u32 2147483648, %v670_v62  ;;  %vm690_vm15 = vcmp.eq.f32.partialorder %v670_v62, 0.0 }
  0xf4   :  { %887 = vpow2.f32 %v523_v1 }
  0xf5   :  { %889 = vpow2.f32 %v521_v51  ;;  %v552_v32 = vpop.permute.xlu1 %551 }
  0xf6   :  { %891 = vpow2.f32 %v527_v4  ;;  %v547_v40 = vpop.permute.xlu0 %546 }
  0xf7   :  { %893 = vpow2.f32 %v525_v63 }
  0xf8   :  { %v880_v5 = vpop.eup %879 }
  0xf9   :  { %v882_v52 = vpop.eup %881  ;;  %v680_v6 = vmul.f32 %v880_v5, %v669_v42  ;;  %v725_v45 = vpop.permute.xlu1 %724 }
  0xfa   :  { %v673_v8 = vmul.f32 %v882_v52, %v668_v43  ;;  %v720_v46 = vpop.permute.xlu0 %719 }
  0xfb   :  { %v682_v30 = vsel %vm681_vm8, %v669_v42, %v680_v6 }
  0xfc   :  { %v884_v49 = vpop.eup %883  ;;  %v685_v9 = vsel %vm683_vm9, %v684_v7, %v682_v30  ;;  %v675_v10 = vsel %vm674_vm10, %v668_v43, %v673_v8 }
  0xfd   :  { %v886_v11 = vpop.eup %885  ;;  %v701_v13 = vsub.f32 0.0, %v685_v9  ;;  %v678_v14 = vsel %vm676_vm11, %v677_v47, %v675_v10  ;;  %v694_v15 = vmul.f32 %v884_v49, %v671_v37  ;;  %v735_v50 = vpop.permute.xlu1 %734 }
  0xfe   :  { %v700_v17 = vsub.f32 0.0, %v678_v14  ;;  %v687_v19 = vmul.f32 %v886_v11, %v670_v62  ;;  %v888_v28 = vpop.eup %887  ;;  %v730_v1 = vpop.permute.xlu0 %729 }
  0xff   :  { %v706_v20 = vmul.f32 1.442695, %v701_v13  ;;  %v696_v21 = vsel %vm695_vm12, %v671_v37, %v694_v15  ;;  %v890_v31 = vpop.eup %889  ;;  %v555_v43 = vmul.f32 %v888_v28, %v542_v12 }
 0x100   :  { %v704_v23 = vmul.f32 1.442695, %v700_v17  ;;  %v699_v24 = vsel %vm697_vm13, %v698_v18, %v696_v21  ;;  %v689_v25 = vsel %vm688_vm14, %v670_v62, %v687_v19  ;;  %v892_v35 = vpop.eup %891  ;;  %v554_v44 = vmul.f32 %v890_v31, %v537_v16 }
 0x101   :  { %895 = vpow2.f32 %v706_v20  ;;  %v703_v26 = vsub.f32 0.0, %v699_v24  ;;  %v692_v27 = vsel %vm690_vm15, %v691_v22, %v689_v25  ;;  %v894_v42 = vpop.eup %893  ;;  %v559_v54 = vadd.f32 %v555_v43, %v1205_v57 }
 0x102   :  { %897 = vpow2.f32 %v704_v23  ;;  %v702_v29 = vsub.f32 0.0, %v692_v27  ;;  %v557_v38 = vmul.f32 %v892_v35, %v552_v32  ;;  %v558_v58 = vadd.f32 %v554_v44, %v1208_v61 }
 0x103   :  { %v710_v33 = vmul.f32 1.442695, %v703_v26  ;;  %v556_v39 = vmul.f32 %v894_v42, %v547_v40 }
 0x104   :  { %v708_v41 = vmul.f32 1.442695, %v702_v29  ;;  %v561_v0 = vadd.f32 %v557_v38, %v1219_v3 }
 0x105   :  { %899 = vpow2.f32 %v710_v33  ;;  %v560_v57 = vadd.f32 %v556_v39, %v1222_v34 }
 0x106   :  { %901 = vpow2.f32 %v708_v41 }
 0x10b   :  { %v896_v36 = vpop.eup %895 }
 0x10c   :  { %v898_v53 = vpop.eup %897  ;;  %v738_v56 = vmul.f32 %v896_v36, %v725_v45 }
 0x10d   :  { %v737_v59 = vmul.f32 %v898_v53, %v720_v46 }
 0x10e   :  { %v742_v60 = vadd.f32 %v738_v56, %v559_v54 }
 0x10f   :  { %v900_v37 = vpop.eup %899  ;;  %v741_v62 = vadd.f32 %v737_v59, %v558_v58 }
 0x110   :  { %v902_v48 = vpop.eup %901  ;;  %746 = vst [vmem:[#allocation2 + $0x8] sm:$0xff] %v742_v60  ;;  %v740_v55 = vmul.f32 %v900_v37, %v735_v50 }
 0x111   :  { %745 = vst [vmem:[#allocation2] sm:$0xff] %v741_v62  ;;  %v739_v2 = vmul.f32 %v902_v48, %v730_v1 }
 0x112   :  { %v744_v51 = vadd.f32 %v740_v55, %v561_v0 }
 0x113   :  { %v743_v61 = vadd.f32 %v739_v2, %v560_v57 }
 0x114   :  { %748 = vst [vmem:[#allocation2 + $0x18] sm:$0xff] %v744_v51 }
 0x115   :  { %747 = vst [vmem:[#allocation2 + $0x10] sm:$0xff] %v743_v61 }
 0x116   :  { %914 = shalt.err (!%p911_p4)
}
 0x117   :  { %s915_s30 = scalar_lea.hbm %s1282_s3, 512 }
 0x118   :  { %p916_p5 = scmp.ne.s32.totalorder %s1282_s3, %s915_s30  ;;  %p919_p6 = scmp.lt.u32.totalorder %s915_s30, %s1282_s3 }
 0x11a   :  { %p921_p7 = pnand %p919_p6, %p916_p5 }
 0x11c   :  { %924 = shalt.err (!%p921_p7)
}
 0x11d   :  { %s929_s2 = smov 128   ;;  %s930_s8 = smov 8  }
 0x11e   :  { %760 = dma.vmem_to_hbm [thread:$0]  %s755_s26, 512, %s1282_s3, [#allocation3], %s929_s2, %s929_s2, %s930_s8  }
 0x11f   :  { %925 = dma.done.wait [#allocation3], 512  }
 0x120   :  { %926 = vsyncadd [#allocation3], 4294966784 }
 0x121   :  { %764 = vsyncpa [#allocation3], 1 }

</bundles_post_ra>
